<compile_context>
chip_gen: v7x
topology: tpu7x:2x2x1
jax: 0.10.0
libtpu: 0.0.40
codegen_flags: <defaults>
</compile_context>

<pallas_src>
import jax
import jax.numpy as jnp
from jax.experimental import pallas as pl
from jax.experimental.pallas import tpu as pltpu


def _round_up(x, m):
    return ((x + m - 1) // m) * m


def _vmem_capacity_bytes():
    """Per-TensorCore VMEM capacity; conservative fallback if unavailable."""
    try:
        return int(pltpu.get_tpu_info().vmem_capacity_bytes)
    except Exception:
        return 64 << 20  # v7x per-TC VMEM (most conservative)


def _auto_block_rows(N, class_tile, itemsize, budget_bytes, max_rows=1024):
    """Pick a row-tile size from a per-block logits byte budget."""
    br = int(budget_bytes // max(1, class_tile * itemsize))
    br = max(8, min(br, max_rows))
    br = min(br, _round_up(N, 8))          # don't over-pad tiny batches
    # Give the 'parallel' row axis >= 2 tiles when there is enough work, so
    # v7x can shard it across both TensorCores (no-op on v5e/v6e).
    if N > 128:
        br = min(br, _round_up(-(-N // 2), 128))
    # Lane-dense output stores: multiples of 128 when possible, else of 8.
    if br >= 128:
        br = (br // 128) * 128
    else:
        br = max(8, (br // 8) * 8)
    return br


def _choose_class_tile(C):
    # Full-C blocks (one class tile, no online-lse carry cost) up to 8192
    # classes; beyond that tile at 8192 and mask the ragged tail in-kernel.
    return C if C <= 8192 else 8192


def _make_lse_kernel(C, class_tile, needs_mask):
    """Build the per-row logsumexp kernel (class axis = online reduction)."""

    def kernel(x_ref, lse_ref, m_sc, l_sc):
        ci = pl.program_id(1)
        nc = pl.num_programs(1)

        @pl.when(ci == 0)
        def _init():
            m_sc[...] = jnp.full(m_sc.shape, -jnp.inf, dtype=jnp.float32)
            l_sc[...] = jnp.zeros(l_sc.shape, dtype=jnp.float32)

        x = x_ref[...]                                        # (R, TC), input dtype
        if needs_mask:
            # Ragged class tail: out-of-bounds columns contain garbage; mask
            # them to -inf so max / sum(exp) ignore them. (Mask is per-column,
            # so every row always keeps >= 1 valid column -> no NaN poisoning.)
            col = (jax.lax.broadcasted_iota(jnp.int32, (1, class_tile), 1)
                   + ci * class_tile)
            x = jnp.where(col < C, x, jnp.asarray(-jnp.inf, dtype=x.dtype))

        # Running max in the input dtype (bf16 compare is exact), f32 carry.
        tile_max = jnp.max(x, axis=-1, keepdims=True).astype(jnp.float32)
        m_prev = m_sc[...]                                    # (R, 1)
        m_new = jnp.maximum(m_prev, tile_max)
        # exp / sum path in f32.
        l_sc[...] = (l_sc[...] * jnp.exp(m_prev - m_new)
                     + jnp.sum(jnp.exp(x.astype(jnp.float32) - m_new),
                               axis=-1, keepdims=True))
        m_sc[...] = m_new

        @pl.when(ci == nc - 1)
        def _finalize():
            lse_col = m_sc[...] + jnp.log(l_sc[...])          # (R, 1) per-row lse
            rows = lse_col.shape[0]
            # Move the per-row column onto the lane axis in <=128-row chunks so
            # output stores are lane-dense. Build one identity mask and reuse it.
            n = min(128, rows)
            ri = jax.lax.broadcasted_iota(jnp.int32, (n, n), 0)
            cj = jax.lax.broadcasted_iota(jnp.int32, (n, n), 1)
            eye = ri == cj
            r0 = 0
            while r0 < rows:
                c = min(128, rows - r0)
                blk = lse_col[r0:r0 + c]                      # (c, 1)
                row_vec = jnp.sum(jnp.where(eye[:c, :c], blk, 0.0),
                                  axis=0, keepdims=True)      # (1, c)
                lse_ref[:, :, r0:r0 + c] = row_vec.reshape(1, 1, c)
                r0 += c

    return kernel


def per_sample_nll(logits, target, block_rows=None, class_tile=None):
    """Per-sample -log_softmax(logits, axis=1)[i, target[i]] via Pallas."""
    N, C = logits.shape
    itemsize = jnp.dtype(logits.dtype).itemsize

    if class_tile is None:
        class_tile = _choose_class_tile(C)
    class_tile = min(class_tile, C)
    num_c = pl.cdiv(C, class_tile)
    needs_mask = (C % class_tile) != 0

    # Per-generation block / VMEM sizing.
    vmem_cap = _vmem_capacity_bytes()
    if vmem_cap >= (100 << 20):          # v5e / v6e: 128 MiB VMEM
        block_budget = 14 << 20
        vmem_limit = 96 << 20
    else:                                # v7x: 64 MiB per TensorCore
        block_budget = 8 << 20
        vmem_limit = 50 << 20
    vmem_limit = int(max(32 << 20, min(vmem_limit, vmem_cap - (8 << 20))))

    if block_rows is None:
        block_rows = _auto_block_rows(N, class_tile, itemsize, block_budget)
    num_r = pl.cdiv(N, block_rows)       # ragged last row tile; no jnp.pad copy

    kernel = _make_lse_kernel(C, class_tile, needs_mask)

    lse = pl.pallas_call(
        kernel,
        out_shape=jax.ShapeDtypeStruct((num_r, 1, block_rows), jnp.float32),
        grid=(num_r, num_c),
        in_specs=[
            pl.BlockSpec((block_rows, class_tile), lambda i, j: (i, j)),  # logits
        ],
        out_specs=pl.BlockSpec((1, 1, block_rows), lambda i, j: (i, 0, 0)),
        scratch_shapes=[
            pltpu.VMEM((block_rows, 1), jnp.float32),   # running max
            pltpu.VMEM((block_rows, 1), jnp.float32),   # running sum(exp(x - max))
        ],
        compiler_params=pltpu.CompilerParams(
            dimension_semantics=("parallel", "arbitrary"),
            vmem_limit_bytes=vmem_limit),
    )(logits)

    # Ragged rows (beyond N) hold garbage lse values; slice them off here so
    # they can never reach any later reduction.
    lse = lse.reshape(num_r * block_rows)[:N]

    # O(N) target-logit gather stays in the wrapper: a real XLA gather (not a
    # one-hot matmul), negligible next to the N*C logits read in the kernel.
    t = target.astype(jnp.int32)
    xt = jnp.take_along_axis(logits, t[:, None], axis=1)[:, 0].astype(jnp.float32)
    return lse - xt


def oesm_cross_entropy(logits, target, down_k=0.9, top_k=0.7):
    """Forward pass of OESM_CrossEntropy(down_k, top_k)."""
    N = logits.shape[0]
    loss = per_sample_nll(logits, target)                 # (N,) f32
    k1 = max(1, min(N, int(down_k * N)))                  # k1 smallest losses
    k2 = max(1, min(k1, int(top_k * k1)))                 # k2 largest of those
    # TODO(synk): the top-k selection over N scalars stays in plain JAX (no
    # Pallas sort primitive); it is negligible next to the N*C logits read.
    neg_smallest, _ = jax.lax.top_k(-loss, k1)            # k1 smallest (negated)
    kept, _ = jax.lax.top_k(-neg_smallest, k2)            # k2 largest of those
    return jnp.mean(kept)


def _reference(logits, target, down_k=0.9, top_k=0.7):
    # pure-JAX reference of the PyTorch semantics, for sanity checking
    logsm = jax.nn.log_softmax(logits.astype(jnp.float32), axis=1)
    loss = -logsm[jnp.arange(logits.shape[0]), target]
    N = logits.shape[0]
    k1 = max(1, min(N, int(down_k * N)))
    k2 = max(1, min(k1, int(top_k * k1)))
    smallest_k1 = jnp.sort(loss)[:k1]
    return jnp.mean(smallest_k1[k1 - k2:])


def _reference_nll(logits, target):
    logsm = jax.nn.log_softmax(logits.astype(jnp.float32), axis=1)
    return -logsm[jnp.arange(logits.shape[0]), target]


if __name__ == "__main__":
    key = jax.random.PRNGKey(0)
    k_x, k_t, k_x2, k_t2 = jax.random.split(key, 4)

    # Test 1: small f32 batch, single class tile, full end-to-end loss.
    N, C = 16, 10
    logits = jax.random.normal(k_x, (N, C), dtype=jnp.float32)
    target = jax.random.randint(k_t, (N,), 0, C, dtype=jnp.int32)

    out = oesm_cross_entropy(logits, target, down_k=0.9, top_k=0.7)
    out = jax.block_until_ready(out)
    ref = _reference(logits, target, down_k=0.9, top_k=0.7)
    assert jnp.allclose(out, ref, atol=1e-5, rtol=1e-5), (out, ref)

    # Test 2: bf16 logits, ragged row tiles (N % block_rows != 0) and a ragged,
    # masked class tail (C % class_tile != 0) to exercise those kernel paths.
    N2, C2 = 37, 200
    logits2 = jax.random.normal(k_x2, (N2, C2), dtype=jnp.float32).astype(jnp.bfloat16)
    target2 = jax.random.randint(k_t2, (N2,), 0, C2, dtype=jnp.int32)

    nll = per_sample_nll(logits2, target2, block_rows=8, class_tile=128)
    nll = jax.block_until_ready(nll)
    nll_ref = _reference_nll(logits2, target2)
    assert jnp.allclose(nll, nll_ref, atol=1e-4, rtol=1e-4), (nll, nll_ref)

    print("KERNEL_OK")
</pallas_src>

<mosaic_0001>
module attributes {stable_mosaic.version = 11 : i64} {
  func.func @kernel(%arg0: i32, %arg1: i32, %arg2: memref<16x10xf32, #tpu.memory_space<vmem>>, %arg3: memref<1x1x16xf32, #tpu.memory_space<vmem>>, %arg4: memref<16x1xf32, #tpu.memory_space<vmem>>, %arg5: memref<16x1xf32, #tpu.memory_space<vmem>>) attributes {dimension_semantics = [#tpu.dimension_semantics<parallel>, #tpu.dimension_semantics<arbitrary>], iteration_bounds = array<i64: 1, 1>, scalar_prefetch = 0 : i64, scratch_operands = 2 : i64, tpu.core_type = #tpu.core_type<tc>, window_params = [{transform_indices = @transform_0, window_bounds = array<i64: 16, 10>}, {transform_indices = @transform_1, window_bounds = array<i64: 1, 1, 16>}]} {
    %c0_i32 = arith.constant 0 : i32
    %0 = arith.cmpi eq, %arg1, %c0_i32 : i32
    %1 = arith.extui %0 : i1 to i32
    %c0_i32_0 = arith.constant 0 : i32
    %2 = arith.cmpi ne, %1, %c0_i32_0 : i32
    scf.if %2 {
      %cst_13 = arith.constant 0xFF800000 : f32
      %23 = vector.broadcast %cst_13 : f32 to vector<16x1xf32>
      %c0_14 = arith.constant 0 : index
      %c0_15 = arith.constant 0 : index
      %24 = vector.load %arg4[%c0_14, %c0_15] : memref<16x1xf32, #tpu.memory_space<vmem>>, vector<16x1xf32>
      tpu.vector_store %arg4[%c0_14, %c0_15], %23 {strides = array<i32>} : memref<16x1xf32, #tpu.memory_space<vmem>>, vector<16x1xf32>,
      %cst_16 = arith.constant 0.000000e+00 : f32
      %25 = vector.broadcast %cst_16 : f32 to vector<16x1xf32>
      %c0_17 = arith.constant 0 : index
      %c0_18 = arith.constant 0 : index
      %26 = vector.load %arg5[%c0_17, %c0_18] : memref<16x1xf32, #tpu.memory_space<vmem>>, vector<16x1xf32>
      tpu.vector_store %arg5[%c0_17, %c0_18], %25 {strides = array<i32>} : memref<16x1xf32, #tpu.memory_space<vmem>>, vector<16x1xf32>,
    } else {
    }
    %c0 = arith.constant 0 : index
    %c0_1 = arith.constant 0 : index
    %3 = vector.load %arg2[%c0, %c0_1] : memref<16x10xf32, #tpu.memory_space<vmem>>, vector<16x10xf32>
    %cst = arith.constant dense<0xFF800000> : vector<16xf32>
    %4 = vector.multi_reduction <maximumf>, %3, %cst [1] : vector<16x10xf32> to vector<16xf32>
    %5 = vector.shape_cast %4 : vector<16xf32> to vector<16x1xf32>
    %c0_2 = arith.constant 0 : index
    %c0_3 = arith.constant 0 : index
    %6 = vector.load %arg4[%c0_2, %c0_3] : memref<16x1xf32, #tpu.memory_space<vmem>>, vector<16x1xf32>
    %7 = arith.maximumf %6, %5 : vector<16x1xf32>
    %c0_4 = arith.constant 0 : index
    %c0_5 = arith.constant 0 : index
    %8 = vector.load %arg5[%c0_4, %c0_5] : memref<16x1xf32, #tpu.memory_space<vmem>>, vector<16x1xf32>
    %9 = arith.subf %6, %7 : vector<16x1xf32>
    %10 = math.exp %9 : vector<16x1xf32>
    %11 = arith.mulf %8, %10 : vector<16x1xf32>
    %12 = vector.broadcast %7 : vector<16x1xf32> to vector<16x10xf32>
    %13 = arith.subf %3, %12 : vector<16x10xf32>
    %14 = math.exp %13 : vector<16x10xf32>
    %cst_6 = arith.constant dense<0.000000e+00> : vector<16xf32>
    %15 = vector.multi_reduction <add>, %14, %cst_6 [1] : vector<16x10xf32> to vector<16xf32>
    %16 = vector.shape_cast %15 : vector<16xf32> to vector<16x1xf32>
    %17 = arith.addf %11, %16 : vector<16x1xf32>
    %c0_7 = arith.constant 0 : index
    %c0_8 = arith.constant 0 : index
    %18 = vector.load %arg5[%c0_7, %c0_8] : memref<16x1xf32, #tpu.memory_space<vmem>>, vector<16x1xf32>
    tpu.vector_store %arg5[%c0_7, %c0_8], %17 {strides = array<i32>} : memref<16x1xf32, #tpu.memory_space<vmem>>, vector<16x1xf32>,
    %c0_9 = arith.constant 0 : index
    %c0_10 = arith.constant 0 : index
    %19 = vector.load %arg4[%c0_9, %c0_10] : memref<16x1xf32, #tpu.memory_space<vmem>>, vector<16x1xf32>
    tpu.vector_store %arg4[%c0_9, %c0_10], %7 {strides = array<i32>} : memref<16x1xf32, #tpu.memory_space<vmem>>, vector<16x1xf32>,
    %c0_i32_11 = arith.constant 0 : i32
    %20 = arith.cmpi eq, %arg1, %c0_i32_11 : i32
    %21 = arith.extui %20 : i1 to i32
    %c0_i32_12 = arith.constant 0 : i32
    %22 = arith.cmpi ne, %21, %c0_i32_12 : i32
    scf.if %22 {
      %c0_13 = arith.constant 0 : index
      %c0_14 = arith.constant 0 : index
      %23 = vector.load %arg4[%c0_13, %c0_14] : memref<16x1xf32, #tpu.memory_space<vmem>>, vector<16x1xf32>
      %c0_15 = arith.constant 0 : index
      %c0_16 = arith.constant 0 : index
      %24 = vector.load %arg5[%c0_15, %c0_16] : memref<16x1xf32, #tpu.memory_space<vmem>>, vector<16x1xf32>
      %25 = math.log %24 : vector<16x1xf32>
      %26 = arith.addf %23, %25 : vector<16x1xf32>
      %27 = tpu.iota {dimensions = array<i32: 0>} : vector<16x16xi32>
      %28 = tpu.iota {dimensions = array<i32: 1>} : vector<16x16xi32>
      %29 = arith.cmpi eq, %27, %28 : vector<16x16xi32>
      %cst_17 = arith.constant 0.000000e+00 : f32
      %30 = vector.shape_cast %26 : vector<16x1xf32> to vector<16x1xf32>
      %31 = vector.broadcast %30 : vector<16x1xf32> to vector<16x16xf32>
      %32 = vector.broadcast %cst_17 : f32 to vector<16x16xf32>
      %33 = arith.select %29, %31, %32 : vector<16x16xi1>, vector<16x16xf32>
      %cst_18 = arith.constant dense<0.000000e+00> : vector<16xf32>
      %34 = vector.multi_reduction <add>, %33, %cst_18 [0] : vector<16x16xf32> to vector<16xf32>
      %35 = vector.shape_cast %34 : vector<16xf32> to vector<1x16xf32>
      %36 = vector.shape_cast %35 : vector<1x16xf32> to vector<1x1x16xf32>
      %c0_19 = arith.constant 0 : index
      %c0_20 = arith.constant 0 : index
      %c0_21 = arith.constant 0 : index
      %37 = vector.load %arg3[%c0_19, %c0_20, %c0_21] : memref<1x1x16xf32, #tpu.memory_space<vmem>>, vector<1x1x16xf32>
      tpu.vector_store %arg3[%c0_19, %c0_20, %c0_21], %36 {strides = array<i32>} : memref<1x1x16xf32, #tpu.memory_space<vmem>>, vector<1x1x16xf32>,
    } else {
    }
    return
  }
  func.func @transform_0(%arg0: i32, %arg1: i32) -> (i32, i32) {
    %c0_i32 = arith.constant 0 : i32
    return %arg0, %arg1 : i32, i32
  }
  func.func @transform_1(%arg0: i32, %arg1: i32) -> (i32, i32, i32) {
    %c0_i32 = arith.constant 0 : i32
    %c0_i32_0 = arith.constant 0 : i32
    %c0_i32_1 = arith.constant 0 : i32
    return %arg0, %c0_i32, %c0_i32_0 : i32, i32, i32
  }
}

</mosaic_0001>

<bundles_post_ra>
// kernel: tpu_custom_call.1
= control target key start
LH: loop header
LB: loop body
LE: loop exit
PB: predicated region body
PF: predicated region fallthrough
CT: control target
= control target key end

     0   :  { %6 = vsyncpa [#allocation5], 0  ;;  %s265_s0 = inlined_call_operand.hbm [shape: f32[16,10], index: 0, kind: input, shape index: {}]   ;;  %s266_s1 = inlined_call_operand.hbm [shape: f32[1,1,16], index: 1, kind: output, shape index: {}]  }
   0x1   :  { %7 = vsyncpa [#allocation6], 0  ;;  %s212_s6 = smov [#allocation4]   ;;  %s164_s10 = scalar_lea.hbm %s265_s0, 256 }
   0x2   :  { %s13_s7 = sshll.u32 %s212_s6, 4  ;;  %p165_p0 = scmp.ne.s32.totalorder %s265_s0, %s164_s10  ;;  %s14_s7 = int_to_ptr.vmem [resolvable:$true] %s13_s7 }
   0x3   :  { %p168_p1 = scmp.lt.u32.totalorder %s164_s10, %s265_s0 }
   0x5   :  { %p170_p2 = pnand %p168_p1, %p165_p0 }
   0x7   :  { %173 = shalt.err (!%p170_p2)
}
   0x8   :  { %s174_s15 = scalar_lea.vmem %s14_s7, 256  ;;  %p179_p4 = scmp.lt.s32.totalorder %s14_s7, %s14_s7 }
   0x9   :  { %p175_p3 = scmp.ne.s32.totalorder %s14_s7, %s174_s15  ;;  %p180_p5 = scmp.lt.s32.totalorder %s174_s15, %s174_s15 }
   0xb   :  { %p181_p6 = por %p180_p5, %p179_p4 }
   0xd   :  { %p182_p7 = pnand %p181_p6, %p175_p3 }
   0xf   :  { %185 = shalt.err (!%p182_p7)
}
  0x10   :  { %s213_s16 = smov 128   ;;  %s214_s17 = smov 8  }
  0x11   :  { %19 = dma.hbm_to_vmem [thread:$0]  %s265_s0, 256, %s14_s7, [#allocation5], %s213_s16, %s213_s16, %s214_s17  }
  0x12   :  { %208 = dma.done.wait [#allocation5], 256  }
  0x13   :  { %209 = vsyncadd [#allocation5], 4294967040  ;;  %vm27_vm0 = vcmask 7168   ;;  %v215_v0 = vmov -inf   ;;  %vm34_vm1 = vcmask 80896   ;;  %v32_v1 = vld [vmem:[#allocation4] sm:$0xff]  ;;  %v97_v47 = vlaneseq }
  0x14   :  { %28 = vst.msk [vmem:[#allocation2] sm:$0xff] %vm27_vm0, %v215_v0  ;;  %29 = vst.msk [vmem:[#allocation2 + $0x8] sm:$0xff] %vm27_vm0, %v215_v0  ;;  %v33_v2 = vld [vmem:[#allocation4 + $0x8] sm:$0xff]  ;;  %v35_v3 = vsel %vm34_vm1, %v32_v1, -inf  ;;  %v216_v5 = vmov 0   ;;  %v217_v6 = vmov 0.0  }
  0x15   :  { %36 = vmax.xlane.f32.xlu0 %v35_v3  ;;  %v38_v4 = vsel %vm34_vm1, %v33_v2, -inf  ;;  %150 = vset.pattern.permute.xlu1 %v216_v5  ;;  %30 = vst.msk [vmem:[#allocation3] sm:$0xff] %vm27_vm0, %v217_v6  ;;  %31 = vst.msk [vmem:[#allocation3 + $0x8] sm:$0xff] %vm27_vm0, %v217_v6  ;;  %v98_v48 = vshrl.u32 %v97_v47, 7  ;;  %v101_v49 = vand.u32 127, %v97_v47  ;;  %vm116_vm4 = vcmask 130048  }
  0x16   :  { %151 = vset.pattern.permute.xlu0 %v216_v5  ;;  %s218_s0 = smov [#allocation7]   ;;  %vm126_vm5 = vcmask 122880  }
  0x17   :  { %v99_v50 = vadd.s32 8, %v98_v48  ;;  %vm102_vm2 = vcmp.eq.s32.totalorder %v98_v48, %v101_v49  ;;  %s134_s20 = sshll.u32 %s218_s0, 4  ;;  %s135_s20 = int_to_ptr.vmem [resolvable:$true] %s134_s20 }
  0x18   :  { %s186_s21 = scalar_lea.vmem %s135_s20, 16  ;;  %s190_s22 = scalar_lea.vmem %s135_s20, 32 }
  0x19   :  { %39 = vmax.xlane.f32.xlu0 %v38_v4  ;;  %vm103_vm3 = vcmp.eq.s32.totalorder %v99_v50, %v101_v49  ;;  %p187_p8 = scmp.ne.s32.totalorder %s135_s20, %s186_s21  ;;  %p191_p9 = scmp.lt.s32.totalorder %s135_s20, %s135_s20 }
  0x1a   :  { %p192_p10 = scmp.lt.s32.totalorder %s190_s22, %s186_s21 }
  0x1b   :  { %v41_v7 = vld [vmem:[#allocation2] sm:$0xff]  ;;  %v42_v10 = vld [vmem:[#allocation2 + $0x8] sm:$0xff] }
  0x1c   :  { %v45_v28 = vld [vmem:[#allocation3] sm:$0xff]  ;;  %v46_v32 = vld [vmem:[#allocation3 + $0x8] sm:$0xff]  ;;  %p193_p11 = por %p192_p10, %p191_p9 }
  0x1e   :  { %p194_p12 = pnand %p193_p11, %p187_p8 }
  0xa2   :  { %v37_v8 = vpop.xlane.xlu0 %36 }
  0xa3   :  { %v43_v9 = vmax.f32 %v41_v7, %v37_v8 }
  0xa5   :  { %v47_v11 = vsub.f32 %v41_v7, %v43_v9  ;;  %82 = vst.msk [vmem:[#allocation2] sm:$0xff] %vm27_vm0, %v43_v9  ;;  %57 = vperm.xlu1 %150, %v43_v9  }
  0xa6   :  { %v40_v12 = vpop.xlane.xlu0 %39 }
  0xa7   :  { %v44_v13 = vmax.f32 %v42_v10, %v40_v12  ;;  %v49_v25 = vmul.f32 1.442695, %v47_v11 }
  0xa9   :  { %v48_v14 = vsub.f32 %v42_v10, %v44_v13  ;;  %83 = vst.msk [vmem:[#allocation2 + $0x8] sm:$0xff] %vm27_vm0, %v44_v13  ;;  %62 = vperm.xlu1 %150, %v44_v13  }
  0xab   :  { %v51_v26 = vmul.f32 1.442695, %v48_v14 }
  0xac   :  { %v87_v41 = vld [vmem:[#allocation2] sm:$0xff] }
  0xb0   :  { %v88_v45 = vld [vmem:[#allocation2 + $0x8] sm:$0xff] }
 0x124   :  { %v58_v15 = vpop.permute.xlu1 %57 }
 0x125   :  { %v65_v16 = vsub.f32 %v32_v1, %v58_v15 }
 0x127   :  { %v67_v17 = vmul.f32 1.442695, %v65_v16 }
 0x128   :  { %v63_v18 = vpop.permute.xlu1 %62 }
 0x129   :  { %152 = vpow2.f32 %v67_v17  ;;  %v66_v19 = vsub.f32 %v33_v2, %v63_v18 }
 0x12b   :  { %v69_v20 = vmul.f32 1.442695, %v66_v19 }
 0x12d   :  { %154 = vpow2.f32 %v69_v20 }
 0x12e   :  { %156 = vpow2.f32 %v49_v25 }
 0x12f   :  { %158 = vpow2.f32 %v51_v26 }
 0x133   :  { %v153_v21 = vpop.eup %152 }
 0x134   :  { %v71_v22 = vsel %vm34_vm1, %v153_v21, 0.0 }
 0x135   :  { %72 = vadd.xlane.f32.xlu0 %v71_v22 }
 0x137   :  { %v155_v23 = vpop.eup %154 }
 0x138   :  { %v74_v24 = vsel %vm34_vm1, %v155_v23, 0.0  ;;  %v157_v27 = vpop.eup %156 }
 0x139   :  { %75 = vadd.xlane.f32.xlu1 %v74_v24  ;;  %v53_v29 = vmul.f32 %v157_v27, %v45_v28  ;;  %v159_v30 = vpop.eup %158 }
 0x13a   :  { %v54_v34 = vmul.f32 %v159_v30, %v46_v32 }
 0x1c2   :  { %v73_v31 = vpop.xlane.xlu0 %72 }
 0x1c3   :  { %v77_v33 = vadd.f32 %v73_v31, %v53_v29 }
 0x1c5   :  { %80 = vst.msk [vmem:[#allocation3] sm:$0xff] %vm27_vm0, %v77_v33 }
 0x1c6   :  { %v76_v35 = vpop.xlane.xlu1 %75 }
 0x1c7   :  { %v78_v36 = vadd.f32 %v76_v35, %v54_v34 }
 0x1c9   :  { %81 = vst.msk [vmem:[#allocation3 + $0x8] sm:$0xff] %vm27_vm0, %v78_v36 }
 0x1cc   :  { %v89_v37 = vld [vmem:[#allocation3] sm:$0xff] }
 0x1cd   :  { %160 = vlog2.f32 %v89_v37 }
 0x1d0   :  { %v90_v38 = vld [vmem:[#allocation3 + $0x8] sm:$0xff] }
 0x1d1   :  { %162 = vlog2.f32 %v90_v38 }
 0x1d7   :  { %v161_v39 = vpop.eup %160 }
 0x1d8   :  { %v92_v40 = vmul.f32 0.6931472, %v161_v39 }
 0x1da   :  { %v95_v42 = vadd.f32 %v92_v40, %v87_v41 }
 0x1db   :  { %v163_v43 = vpop.eup %162 }
 0x1dc   :  { %106 = vperm.xlu0 %151, %v95_v42   ;;  %v94_v44 = vmul.f32 0.6931472, %v163_v43 }
 0x1de   :  { %v96_v46 = vadd.f32 %v94_v44, %v88_v45 }
 0x1e0   :  { %111 = vperm.xlu1 %150, %v96_v46  }
 0x25b   :  { %v107_v51 = vpop.permute.xlu0 %106 }
 0x25c   :  { %v114_v52 = vsel %vm102_vm2, %v107_v51, 0.0 }
 0x25d   :  { %v117_v55 = vsel %vm116_vm4, %v114_v52, 0.0 }
 0x25f   :  { %v112_v53 = vpop.permute.xlu1 %111 }
 0x260   :  { %v115_v54 = vsel %vm103_vm3, %v112_v53, 0.0 }
 0x261   :  { %v118_v56 = vsel %vm116_vm4, %v115_v54, 0.0 }
 0x262   :  { %v119_v57 = vadd.f32 %v118_v56, %v117_v55 }
 0x264   :  { %v120_v58 = vrot.slane %v119_v57, 4 }
 0x266   :  { %v121_v59 = vadd.f32 %v120_v58, %v119_v57 }
 0x268   :  { %v122_v60 = vrot.slane %v121_v59, 2 }
 0x26a   :  { %v123_v61 = vadd.f32 %v122_v60, %v121_v59 }
 0x26c   :  { %v124_v62 = vrot.slane %v123_v61, 1 }
 0x26e   :  { %v125_v63 = vadd.f32 %v124_v62, %v123_v61 }
 0x270   :  { %127 = vst.msk [vmem:[#allocation7] sm:$0x1] %vm126_vm5, %v125_v63 }
 0x271   :  { %197 = shalt.err (!%p194_p12)
}
 0x272   :  { %s198_s25 = scalar_lea.hbm %s266_s1, 16 }
 0x273   :  { %p199_p13 = scmp.ne.s32.totalorder %s266_s1, %s198_s25  ;;  %p202_p0 = scmp.lt.u32.totalorder %s198_s25, %s266_s1 }
 0x275   :  { %p204_p1 = pnand %p202_p0, %p199_p13 }
 0x277   :  { %207 = shalt.err (!%p204_p1)
}
 0x278   :  { %137 = dma.vmem_to_hbm [thread:$0]  %s135_s20, 16, %s266_s1, [#allocation6]  }
 0x279   :  { %210 = dma.done.wait [#allocation6], 16  }
 0x27a   :  { %211 = vsyncadd [#allocation6], 4294967280 }
 0x27b   :  { %141 = vsyncpa [#allocation5], 1 }
 0x27c   :  { %142 = vsyncpa [#allocation6], 1 }

</bundles_post_ra>
